<compile_context>
chip_gen: v7x
topology: tpu7x:2x2x1
jax: 0.10.0
libtpu: 0.0.40
codegen_flags: <defaults>
</compile_context>

<pallas_src>
import numpy as np
import jax
import jax.numpy as jnp
from jax.experimental import pallas as pl
from jax.experimental.pallas import tpu as pltpu

SCORE_TH = 0.2
SIM_TH = 0.9
_BIG = 2 ** 30          # int32 sentinel for first-occurrence argmax
_SUB = 16               # sublane padding (bf16-friendly)
_LANE = 128
_MAX_TILE_M = 256


def _round_up(x, m):
    return ((x + m - 1) // m) * m


def _masked_sim(prev_desc, desc, keep_row):
    """(TM, Np) similarity: thresholded like the reference, with filtered/padded
    columns forced to -1 so they can never win an argmax (exactly emulates the
    reference's row filtering)."""
    sim = jax.lax.dot_general(
        prev_desc, desc, (((1,), (1,)), ((), ())),
        preferred_element_type=jnp.float32)                 # bf16 x bf16 -> f32, one MXU pass
    sim = jnp.where(sim < SIM_TH, jnp.float32(0.0), sim)    # sim[sim < 0.9] = 0
    return jnp.where(keep_row > 0.5, sim, jnp.float32(-1.0))


def _colstats_kernel(prev_desc_ref, desc_ref, keep_ref, nn21_ref, colmax_ref):
    """Pass 1: running column max / first-occurrence argmax (= nn21) over M tiles."""
    t = pl.program_id(0)
    tm = prev_desc_ref.shape[0]

    @pl.when(t == 0)
    def _():
        colmax_ref[...] = jnp.full(colmax_ref.shape, -2.0, colmax_ref.dtype)
        nn21_ref[...] = jnp.full(nn21_ref.shape, _BIG, nn21_ref.dtype)

    simt = _masked_sim(prev_desc_ref[...], desc_ref[...], keep_ref[...])
    tile_max = jnp.max(simt, axis=0, keepdims=True)                         # (1, Np)
    row_ids = jax.lax.broadcasted_iota(jnp.int32, simt.shape, 0) + t * tm
    tile_arg = jnp.min(jnp.where(simt == tile_max, row_ids, _BIG),
                       axis=0, keepdims=True)                               # (1, Np)

    old_max = colmax_ref[...]
    old_arg = nn21_ref[...]
    new_max = jnp.maximum(old_max, tile_max)
    cand_old = jnp.where(old_max == new_max, old_arg, _BIG)
    cand_new = jnp.where(tile_max == new_max, tile_arg, _BIG)
    colmax_ref[...] = new_max
    nn21_ref[...] = jnp.minimum(cand_old, cand_new)


def _match_kernel(nn21_ref, prev_desc_ref, desc_ref, keep_ref, kpt_ref,
                  prev_kp_ref, out_ref):
    """Pass 2: per-row argmax, mutual-consistency mask, matched-kp gather, distance.
    Packs [mask, mkp2_x, mkp2_y, dist, 0...] into a lane-dense (TM, 128) slab."""
    t = pl.program_id(0)
    tm = prev_desc_ref.shape[0]

    simt = _masked_sim(prev_desc_ref[...], desc_ref[...], keep_ref[...])
    row_max = jnp.max(simt, axis=1, keepdims=True)                          # (TM, 1)
    col_ids = jax.lax.broadcasted_iota(jnp.int32, simt.shape, 1)
    nn12 = jnp.min(jnp.where(simt == row_max, col_ids, _BIG),
                   axis=1, keepdims=True)                                   # (TM, 1)

    onehot = col_ids == nn12                                                # (TM, Np)
    row_ids = jax.lax.broadcasted_iota(jnp.int32, simt.shape, 0) + t * tm
    mutual = jnp.logical_and(onehot, nn21_ref[...] == row_ids)
    maskf = jnp.max(jnp.where(mutual, 1.0, 0.0), axis=1, keepdims=True)     # (TM, 1)

    # matched_keypoints2 = keypoints[nn12] via exact one-hot row selection
    kx = kpt_ref[0:1, :]                                                    # (1, Np)
    ky = kpt_ref[1:2, :]
    zero = jnp.float32(0.0)
    mkp2x = jnp.sum(jnp.where(onehot, kx, zero), axis=1, keepdims=True)     # (TM, 1)
    mkp2y = jnp.sum(jnp.where(onehot, ky, zero), axis=1, keepdims=True)

    dx = prev_kp_ref[:, 0:1] - mkp2x
    dy = prev_kp_ref[:, 1:2] - mkp2y
    dist = jnp.sqrt(dx * dx + dy * dy)

    lane = jax.lax.broadcasted_iota(jnp.int32, (tm, out_ref.shape[1]), 1)
    out = jnp.where(lane == 0, maskf,
          jnp.where(lane == 1, mkp2x,
          jnp.where(lane == 2, mkp2y,
          jnp.where(lane == 3, dist, zero))))
    out_ref[...] = out


def mnn_match_core(prev_descriptors, descriptors, scores, prev_keypoints, keypoints):
    M, D = prev_descriptors.shape
    N = descriptors.shape[0]

    Dp = _round_up(D, _LANE)
    Np = _round_up(N, _LANE)
    Mp16 = _round_up(M, _SUB)
    TM = min(_MAX_TILE_M, Mp16)
    Mp = _round_up(Mp16, TM)
    n_tiles = Mp // TM

    f32 = jnp.float32
    prev_desc_b = jnp.pad(prev_descriptors.astype(f32),
                          ((0, Mp - M), (0, Dp - D))).astype(jnp.bfloat16)
    desc_b = jnp.pad(descriptors.astype(f32),
                     ((0, Np - N), (0, Dp - D))).astype(jnp.bfloat16)
    keep = (scores[:, 0] > SCORE_TH).astype(f32)
    keep = jnp.pad(keep, (0, Np - N)).reshape(1, Np)
    kpt = jnp.zeros((8, Np), f32)
    kpt = kpt.at[0, :N].set(keypoints[:, 0].astype(f32))
    kpt = kpt.at[1, :N].set(keypoints[:, 1].astype(f32))
    prev_kp = jnp.pad(prev_keypoints.astype(f32), ((0, Mp - M), (0, 0)))

    vmem_cap = 32 * 1024 * 1024
    cp_seq = pltpu.CompilerParams(dimension_semantics=("arbitrary",),
                                  vmem_limit_bytes=vmem_cap)
    cp_par = pltpu.CompilerParams(dimension_semantics=("parallel",),
                                  vmem_limit_bytes=vmem_cap)

    # Pass 1: global column argmax (nn21) via running reduction over M tiles.
    nn21 = pl.pallas_call(
        _colstats_kernel,
        out_shape=jax.ShapeDtypeStruct((1, Np), jnp.int32),
        grid=(n_tiles,),
        in_specs=[
            pl.BlockSpec((TM, Dp), lambda t: (t, 0)),
            pl.BlockSpec((Np, Dp), lambda t: (0, 0)),
            pl.BlockSpec((1, Np), lambda t: (0, 0)),
        ],
        out_specs=pl.BlockSpec((1, Np), lambda t: (0, 0)),
        scratch_shapes=[pltpu.VMEM((1, Np), jnp.float32)],
        compiler_params=cp_seq,
    )(prev_desc_b, desc_b, keep)

    # Pass 2: per-row results, independent M tiles (parallel across TensorCores).
    packed = pl.pallas_call(
        _match_kernel,
        out_shape=jax.ShapeDtypeStruct((Mp, 128), jnp.float32),
        grid=(n_tiles,),
        in_specs=[
            pl.BlockSpec((1, Np), lambda t: (0, 0)),
            pl.BlockSpec((TM, Dp), lambda t: (t, 0)),
            pl.BlockSpec((Np, Dp), lambda t: (0, 0)),
            pl.BlockSpec((1, Np), lambda t: (0, 0)),
            pl.BlockSpec((8, Np), lambda t: (0, 0)),
            pl.BlockSpec((TM, 2), lambda t: (t, 0)),
        ],
        out_specs=pl.BlockSpec((TM, 128), lambda t: (t, 0)),
        compiler_params=cp_par,
    )(nn21, prev_desc_b, desc_b, keep, kpt, prev_kp)

    return packed[:M]


_mnn_match_jit = jax.jit(mnn_match_core)


def model_forward(keypoints, descriptors, scores, prev_keypoints, prev_descriptors):
    packed = jax.block_until_ready(
        _mnn_match_jit(jnp.asarray(prev_descriptors), jnp.asarray(descriptors),
                       jnp.asarray(scores), jnp.asarray(prev_keypoints),
                       jnp.asarray(keypoints)))
    out = np.asarray(packed)
    # TODO(synk): data-dependent-shape compaction of the mutual-match list has no
    # static Pallas form; done as host glue (single device->host transfer).
    m = out[:, 0] > 0.5
    matched_keypoints1 = np.asarray(prev_keypoints)[m]
    matched_keypoints2 = out[m, 1:3]
    euclidean_distance = out[m, 3]
    return matched_keypoints1, matched_keypoints2, euclidean_distance


def numpy_reference(keypoints, descriptors, scores, prev_keypoints, prev_descriptors):
    kp = np.asarray(keypoints); desc = np.asarray(descriptors)
    sc = np.asarray(scores); pkp = np.asarray(prev_keypoints)
    pdesc = np.asarray(prev_descriptors)
    keep = sc[:, 0] > SCORE_TH
    kp = kp[keep]; desc = desc[keep]
    sim = pdesc @ desc.T
    sim[sim < SIM_TH] = 0.0
    nn12 = np.argmax(sim, axis=1)
    nn21 = np.argmax(sim, axis=0)
    ids1 = np.arange(sim.shape[0])
    mask = ids1 == nn21[nn12]
    matches = np.stack([ids1[mask], nn12[mask]]).T
    mk1 = pkp[matches[:, 0]]
    mk2 = kp[matches[:, 1]]
    sub = mk1 - mk2
    return mk1, mk2, np.sqrt(np.sum(sub * sub, axis=1))


if __name__ == "__main__":
    M, N, D = 16, 16, 32  # prev keypoints, current keypoints, descriptor dim
    key = jax.random.PRNGKey(0)
    k1, k2, k3, k4, k5 = jax.random.split(key, 5)

    prev_keypoints = jax.random.uniform(k1, (M, 2), jnp.float32, 0.0, 128.0)
    keypoints = jax.random.uniform(k2, (N, 2), jnp.float32, 0.0, 128.0)

    prev_descriptors = jax.random.normal(k3, (M, D), jnp.float32)
    prev_descriptors = prev_descriptors / jnp.linalg.norm(
        prev_descriptors, axis=1, keepdims=True)

    descriptors = jax.random.normal(k4, (N, D), jnp.float32)
    # plant exact matches: current descriptors 0..4 duplicate prev descriptors 3..7
    descriptors = descriptors.at[0:5].set(prev_descriptors[3:8])
    descriptors = descriptors / jnp.linalg.norm(descriptors, axis=1, keepdims=True)

    scores = jax.random.uniform(k5, (N, 1), jnp.float32)
    scores = scores.at[0:5, 0].set(0.9)  # planted matches pass the score filter

    mk1, mk2, ed = model_forward(keypoints, descriptors, scores,
                                 prev_keypoints, prev_descriptors)

    r1, r2, re = numpy_reference(keypoints, descriptors, scores,
                                 prev_keypoints, prev_descriptors)
    assert mk1.shape == r1.shape and mk2.shape == r2.shape and ed.shape == re.shape
    np.testing.assert_allclose(mk1, r1, atol=1e-4, rtol=1e-4)
    np.testing.assert_allclose(mk2, r2, atol=1e-4, rtol=1e-4)
    np.testing.assert_allclose(ed, re, atol=1e-3, rtol=1e-3)

    print("KERNEL_OK")
</pallas_src>

<mosaic_0001>
module attributes {stable_mosaic.version = 11 : i64} {
  func.func @_match_kernel(%arg0: i32, %arg1: memref<1x128xi32, #tpu.memory_space<vmem>>, %arg2: memref<16x128xbf16, #tpu.memory_space<vmem>>, %arg3: memref<128x128xbf16, #tpu.memory_space<vmem>>, %arg4: memref<1x128xf32, #tpu.memory_space<vmem>>, %arg5: memref<8x128xf32, #tpu.memory_space<vmem>>, %arg6: memref<16x2xf32, #tpu.memory_space<vmem>>, %arg7: memref<16x128xf32, #tpu.memory_space<vmem>>) attributes {dimension_semantics = [#tpu.dimension_semantics<parallel>], iteration_bounds = array<i64: 1>, scalar_prefetch = 0 : i64, scratch_operands = 0 : i64, tpu.core_type = #tpu.core_type<tc>, window_params = [{pipeline_mode = #tpu.pipeline_mode<synchronous>, transform_indices = @transform_0, window_bounds = array<i64: 1, 128>}, {transform_indices = @transform_1, window_bounds = array<i64: 16, 128>}, {pipeline_mode = #tpu.pipeline_mode<synchronous>, transform_indices = @transform_2, window_bounds = array<i64: 128, 128>}, {pipeline_mode = #tpu.pipeline_mode<synchronous>, transform_indices = @transform_3, window_bounds = array<i64: 1, 128>}, {pipeline_mode = #tpu.pipeline_mode<synchronous>, transform_indices = @transform_4, window_bounds = array<i64: 8, 128>}, {transform_indices = @transform_5, window_bounds = array<i64: 16, 2>}, {transform_indices = @transform_6, window_bounds = array<i64: 16, 128>}]} {
    %c0 = arith.constant 0 : index
    %c0_0 = arith.constant 0 : index
    %0 = vector.load %arg2[%c0, %c0_0] : memref<16x128xbf16, #tpu.memory_space<vmem>>, vector<16x128xbf16>
    %c0_1 = arith.constant 0 : index
    %c0_2 = arith.constant 0 : index
    %1 = vector.load %arg3[%c0_1, %c0_2] : memref<128x128xbf16, #tpu.memory_space<vmem>>, vector<128x128xbf16>
    %c0_3 = arith.constant 0 : index
    %c0_4 = arith.constant 0 : index
    %2 = vector.load %arg4[%c0_3, %c0_4] : memref<1x128xf32, #tpu.memory_space<vmem>>, vector<1x128xf32>
    %cst = arith.constant dense<0.000000e+00> : vector<16x128xf32>
    %3 = tpu.matmul %0, %1, %cst {dimension_numbers = #tpu.dot_dimension_numbers<[1], [1], [0], [0], [0, 0, 1, 0], [], []>} : vector<16x128xbf16>, vector<128x128xbf16>, vector<16x128xf32> -> vector<16x128xf32>
    %cst_5 = arith.constant 0.899999976 : f32
    %4 = vector.broadcast %cst_5 : f32 to vector<16x128xf32>
    %5 = arith.cmpf olt, %3, %4 : vector<16x128xf32>
    %cst_6 = arith.constant 0.000000e+00 : f32
    %6 = vector.broadcast %cst_6 : f32 to vector<16x128xf32>
    %7 = arith.select %5, %6, %3 : vector<16x128xi1>, vector<16x128xf32>
    %cst_7 = arith.constant 5.000000e-01 : f32
    %8 = vector.broadcast %cst_7 : f32 to vector<1x128xf32>
    %9 = arith.cmpf ogt, %2, %8 : vector<1x128xf32>
    %cst_8 = arith.constant -1.000000e+00 : f32
    %10 = vector.shape_cast %9 : vector<1x128xi1> to vector<1x128xi1>
    %11 = vector.broadcast %10 : vector<1x128xi1> to vector<16x128xi1>
    %12 = vector.broadcast %cst_8 : f32 to vector<16x128xf32>
    %13 = arith.select %11, %7, %12 : vector<16x128xi1>, vector<16x128xf32>
    %cst_9 = arith.constant dense<0xFF800000> : vector<16xf32>
    %14 = vector.multi_reduction <maximumf>, %13, %cst_9 [1] : vector<16x128xf32> to vector<16xf32>
    %15 = vector.shape_cast %14 : vector<16xf32> to vector<16x1xf32>
    %16 = tpu.iota {dimensions = array<i32: 1>} : vector<16x128xi32>
    %17 = vector.broadcast %15 : vector<16x1xf32> to vector<16x128xf32>
    %18 = arith.cmpf oeq, %13, %17 : vector<16x128xf32>
    %c1073741824_i32 = arith.constant 1073741824 : i32
    %19 = vector.broadcast %c1073741824_i32 : i32 to vector<16x128xi32>
    %20 = arith.select %18, %16, %19 : vector<16x128xi1>, vector<16x128xi32>
    %cst_10 = arith.constant dense<2147483647> : vector<16xi32>
    %21 = vector.multi_reduction <minsi>, %20, %cst_10 [1] : vector<16x128xi32> to vector<16xi32>
    %22 = vector.shape_cast %21 : vector<16xi32> to vector<16x1xi32>
    %23 = vector.broadcast %22 : vector<16x1xi32> to vector<16x128xi32>
    %24 = arith.cmpi eq, %16, %23 : vector<16x128xi32>
    %25 = tpu.iota {dimensions = array<i32: 0>} : vector<16x128xi32>
    %c16_i32 = arith.constant 16 : i32
    %26 = arith.muli %arg0, %c16_i32 : i32
    %27 = vector.broadcast %26 : i32 to vector<16x128xi32>
    %28 = arith.addi %25, %27 : vector<16x128xi32>
    %c0_11 = arith.constant 0 : index
    %c0_12 = arith.constant 0 : index
    %29 = vector.load %arg1[%c0_11, %c0_12] : memref<1x128xi32, #tpu.memory_space<vmem>>, vector<1x128xi32>
    %30 = vector.broadcast %29 : vector<1x128xi32> to vector<16x128xi32>
    %31 = arith.cmpi eq, %30, %28 : vector<16x128xi32>
    %32 = arith.andi %24, %31 : vector<16x128xi1>
    %cst_13 = arith.constant 1.000000e+00 : f32
    %cst_14 = arith.constant 0.000000e+00 : f32
    %33 = vector.broadcast %cst_13 : f32 to vector<16x128xf32>
    %34 = vector.broadcast %cst_14 : f32 to vector<16x128xf32>
    %35 = arith.select %32, %33, %34 : vector<16x128xi1>, vector<16x128xf32>
    %cst_15 = arith.constant dense<0xFF800000> : vector<16xf32>
    %36 = vector.multi_reduction <maximumf>, %35, %cst_15 [1] : vector<16x128xf32> to vector<16xf32>
    %37 = vector.shape_cast %36 : vector<16xf32> to vector<16x1xf32>
    %c0_16 = arith.constant 0 : index
    %c0_17 = arith.constant 0 : index
    %38 = vector.load %arg5[%c0_16, %c0_17] : memref<8x128xf32, #tpu.memory_space<vmem>>, vector<1x128xf32>
    %c1 = arith.constant 1 : index
    %c0_18 = arith.constant 0 : index
    %39 = vector.load %arg5[%c1, %c0_18] : memref<8x128xf32, #tpu.memory_space<vmem>>, vector<1x128xf32>
    %cst_19 = arith.constant 0.000000e+00 : f32
    %40 = vector.shape_cast %38 : vector<1x128xf32> to vector<1x128xf32>
    %41 = vector.broadcast %40 : vector<1x128xf32> to vector<16x128xf32>
    %42 = vector.broadcast %cst_19 : f32 to vector<16x128xf32>
    %43 = arith.select %24, %41, %42 : vector<16x128xi1>, vector<16x128xf32>
    %cst_20 = arith.constant dense<0.000000e+00> : vector<16xf32>
    %44 = vector.multi_reduction <add>, %43, %cst_20 [1] : vector<16x128xf32> to vector<16xf32>
    %45 = vector.shape_cast %44 : vector<16xf32> to vector<16x1xf32>
    %cst_21 = arith.constant 0.000000e+00 : f32
    %46 = vector.shape_cast %39 : vector<1x128xf32> to vector<1x128xf32>
    %47 = vector.broadcast %46 : vector<1x128xf32> to vector<16x128xf32>
    %48 = vector.broadcast %cst_21 : f32 to vector<16x128xf32>
    %49 = arith.select %24, %47, %48 : vector<16x128xi1>, vector<16x128xf32>
    %cst_22 = arith.constant dense<0.000000e+00> : vector<16xf32>
    %50 = vector.multi_reduction <add>, %49, %cst_22 [1] : vector<16x128xf32> to vector<16xf32>
    %51 = vector.shape_cast %50 : vector<16xf32> to vector<16x1xf32>
    %c0_23 = arith.constant 0 : index
    %c0_24 = arith.constant 0 : index
    %52 = vector.load %arg6[%c0_23, %c0_24] : memref<16x2xf32, #tpu.memory_space<vmem>>, vector<16x1xf32>
    %53 = arith.subf %52, %45 : vector<16x1xf32>
    %c0_25 = arith.constant 0 : index
    %c1_26 = arith.constant 1 : index
    %54 = vector.load %arg6[%c0_25, %c1_26] : memref<16x2xf32, #tpu.memory_space<vmem>>, vector<16x1xf32>
    %55 = arith.subf %54, %51 : vector<16x1xf32>
    %56 = arith.mulf %53, %53 : vector<16x1xf32>
    %57 = arith.mulf %55, %55 : vector<16x1xf32>
    %58 = arith.addf %56, %57 : vector<16x1xf32>
    %59 = math.sqrt %58 : vector<16x1xf32>
    %60 = tpu.iota {dimensions = array<i32: 1>} : vector<16x128xi32>
    %c0_i32 = arith.constant 0 : i32
    %61 = vector.broadcast %c0_i32 : i32 to vector<16x128xi32>
    %62 = arith.cmpi eq, %60, %61 : vector<16x128xi32>
    %c1_i32 = arith.constant 1 : i32
    %63 = vector.broadcast %c1_i32 : i32 to vector<16x128xi32>
    %64 = arith.cmpi eq, %60, %63 : vector<16x128xi32>
    %c2_i32 = arith.constant 2 : i32
    %65 = vector.broadcast %c2_i32 : i32 to vector<16x128xi32>
    %66 = arith.cmpi eq, %60, %65 : vector<16x128xi32>
    %c3_i32 = arith.constant 3 : i32
    %67 = vector.broadcast %c3_i32 : i32 to vector<16x128xi32>
    %68 = arith.cmpi eq, %60, %67 : vector<16x128xi32>
    %cst_27 = arith.constant 0.000000e+00 : f32
    %69 = vector.shape_cast %59 : vector<16x1xf32> to vector<16x1xf32>
    %70 = vector.broadcast %69 : vector<16x1xf32> to vector<16x128xf32>
    %71 = vector.broadcast %cst_27 : f32 to vector<16x128xf32>
    %72 = arith.select %68, %70, %71 : vector<16x128xi1>, vector<16x128xf32>
    %73 = vector.shape_cast %51 : vector<16x1xf32> to vector<16x1xf32>
    %74 = vector.broadcast %73 : vector<16x1xf32> to vector<16x128xf32>
    %75 = arith.select %66, %74, %72 : vector<16x128xi1>, vector<16x128xf32>
    %76 = vector.shape_cast %45 : vector<16x1xf32> to vector<16x1xf32>
    %77 = vector.broadcast %76 : vector<16x1xf32> to vector<16x128xf32>
    %78 = arith.select %64, %77, %75 : vector<16x128xi1>, vector<16x128xf32>
    %79 = vector.shape_cast %37 : vector<16x1xf32> to vector<16x1xf32>
    %80 = vector.broadcast %79 : vector<16x1xf32> to vector<16x128xf32>
    %81 = arith.select %62, %80, %78 : vector<16x128xi1>, vector<16x128xf32>
    %c0_28 = arith.constant 0 : index
    %c0_29 = arith.constant 0 : index
    %82 = vector.load %arg7[%c0_28, %c0_29] : memref<16x128xf32, #tpu.memory_space<vmem>>, vector<16x128xf32>
    tpu.vector_store %arg7[%c0_28, %c0_29], %81 {strides = array<i32>} : memref<16x128xf32, #tpu.memory_space<vmem>>, vector<16x128xf32>,
    return
  }
  func.func @transform_0(%arg0: i32) -> (i32, i32) {
    %c0_i32 = arith.constant 0 : i32
    %c0_i32_0 = arith.constant 0 : i32
    %c0_i32_1 = arith.constant 0 : i32
    return %c0_i32, %c0_i32_0 : i32, i32
  }
  func.func @transform_1(%arg0: i32) -> (i32, i32) {
    %c0_i32 = arith.constant 0 : i32
    %c0_i32_0 = arith.constant 0 : i32
    return %arg0, %c0_i32 : i32, i32
  }
  func.func @transform_2(%arg0: i32) -> (i32, i32) {
    %c0_i32 = arith.constant 0 : i32
    %c0_i32_0 = arith.constant 0 : i32
    %c0_i32_1 = arith.constant 0 : i32
    return %c0_i32, %c0_i32_0 : i32, i32
  }
  func.func @transform_3(%arg0: i32) -> (i32, i32) {
    %c0_i32 = arith.constant 0 : i32
    %c0_i32_0 = arith.constant 0 : i32
    %c0_i32_1 = arith.constant 0 : i32
    return %c0_i32, %c0_i32_0 : i32, i32
  }
  func.func @transform_4(%arg0: i32) -> (i32, i32) {
    %c0_i32 = arith.constant 0 : i32
    %c0_i32_0 = arith.constant 0 : i32
    %c0_i32_1 = arith.constant 0 : i32
    return %c0_i32, %c0_i32_0 : i32, i32
  }
  func.func @transform_5(%arg0: i32) -> (i32, i32) {
    %c0_i32 = arith.constant 0 : i32
    %c0_i32_0 = arith.constant 0 : i32
    return %arg0, %c0_i32 : i32, i32
  }
  func.func @transform_6(%arg0: i32) -> (i32, i32) {
    %c0_i32 = arith.constant 0 : i32
    %c0_i32_0 = arith.constant 0 : i32
    return %arg0, %c0_i32 : i32, i32
  }
}

module attributes {stable_mosaic.version = 11 : i64} {
  func.func @_colstats_kernel(%arg0: i32, %arg1: memref<16x128xbf16, #tpu.memory_space<vmem>>, %arg2: memref<128x128xbf16, #tpu.memory_space<vmem>>, %arg3: memref<1x128xf32, #tpu.memory_space<vmem>>, %arg4: memref<1x128xi32, #tpu.memory_space<vmem>>, %arg5: memref<1x128xf32, #tpu.memory_space<vmem>>) attributes {dimension_semantics = [#tpu.dimension_semantics<arbitrary>], iteration_bounds = array<i64: 1>, scalar_prefetch = 0 : i64, scratch_operands = 1 : i64, tpu.core_type = #tpu.core_type<tc>, window_params = [{transform_indices = @transform_0, window_bounds = array<i64: 16, 128>}, {pipeline_mode = #tpu.pipeline_mode<synchronous>, transform_indices = @transform_1, window_bounds = array<i64: 128, 128>}, {pipeline_mode = #tpu.pipeline_mode<synchronous>, transform_indices = @transform_2, window_bounds = array<i64: 1, 128>}, {pipeline_mode = #tpu.pipeline_mode<synchronous>, transform_indices = @transform_3, window_bounds = array<i64: 1, 128>}]} {
    %c0_i32 = arith.constant 0 : i32
    %0 = arith.cmpi eq, %arg0, %c0_i32 : i32
    %1 = arith.extui %0 : i1 to i32
    %c0_i32_0 = arith.constant 0 : i32
    %2 = arith.cmpi ne, %1, %c0_i32_0 : i32
    scf.if %2 {
      %cst_22 = arith.constant -2.000000e+00 : f32
      %41 = vector.broadcast %cst_22 : f32 to vector<1x128xf32>
      %c0_23 = arith.constant 0 : index
      %c0_24 = arith.constant 0 : index
      %42 = vector.load %arg5[%c0_23, %c0_24] : memref<1x128xf32, #tpu.memory_space<vmem>>, vector<1x128xf32>
      tpu.vector_store %arg5[%c0_23, %c0_24], %41 {strides = array<i32>} : memref<1x128xf32, #tpu.memory_space<vmem>>, vector<1x128xf32>,
      %c1073741824_i32_25 = arith.constant 1073741824 : i32
      %43 = vector.broadcast %c1073741824_i32_25 : i32 to vector<1x128xi32>
      %c0_26 = arith.constant 0 : index
      %c0_27 = arith.constant 0 : index
      %44 = vector.load %arg4[%c0_26, %c0_27] : memref<1x128xi32, #tpu.memory_space<vmem>>, vector<1x128xi32>
      tpu.vector_store %arg4[%c0_26, %c0_27], %43 {strides = array<i32>} : memref<1x128xi32, #tpu.memory_space<vmem>>, vector<1x128xi32>,
    } else {
    }
    %c0 = arith.constant 0 : index
    %c0_1 = arith.constant 0 : index
    %3 = vector.load %arg1[%c0, %c0_1] : memref<16x128xbf16, #tpu.memory_space<vmem>>, vector<16x128xbf16>
    %c0_2 = arith.constant 0 : index
    %c0_3 = arith.constant 0 : index
    %4 = vector.load %arg2[%c0_2, %c0_3] : memref<128x128xbf16, #tpu.memory_space<vmem>>, vector<128x128xbf16>
    %c0_4 = arith.constant 0 : index
    %c0_5 = arith.constant 0 : index
    %5 = vector.load %arg3[%c0_4, %c0_5] : memref<1x128xf32, #tpu.memory_space<vmem>>, vector<1x128xf32>
    %cst = arith.constant dense<0.000000e+00> : vector<16x128xf32>
    %6 = tpu.matmul %3, %4, %cst {dimension_numbers = #tpu.dot_dimension_numbers<[1], [1], [0], [0], [0, 0, 1, 0], [], []>} : vector<16x128xbf16>, vector<128x128xbf16>, vector<16x128xf32> -> vector<16x128xf32>
    %cst_6 = arith.constant 0.899999976 : f32
    %7 = vector.broadcast %cst_6 : f32 to vector<16x128xf32>
    %8 = arith.cmpf olt, %6, %7 : vector<16x128xf32>
    %cst_7 = arith.constant 0.000000e+00 : f32
    %9 = vector.broadcast %cst_7 : f32 to vector<16x128xf32>
    %10 = arith.select %8, %9, %6 : vector<16x128xi1>, vector<16x128xf32>
    %cst_8 = arith.constant 5.000000e-01 : f32
    %11 = vector.broadcast %cst_8 : f32 to vector<1x128xf32>
    %12 = arith.cmpf ogt, %5, %11 : vector<1x128xf32>
    %cst_9 = arith.constant -1.000000e+00 : f32
    %13 = vector.shape_cast %12 : vector<1x128xi1> to vector<1x128xi1>
    %14 = vector.broadcast %13 : vector<1x128xi1> to vector<16x128xi1>
    %15 = vector.broadcast %cst_9 : f32 to vector<16x128xf32>
    %16 = arith.select %14, %10, %15 : vector<16x128xi1>, vector<16x128xf32>
    %cst_10 = arith.constant dense<0xFF800000> : vector<128xf32>
    %17 = vector.multi_reduction <maximumf>, %16, %cst_10 [0] : vector<16x128xf32> to vector<128xf32>
    %18 = vector.shape_cast %17 : vector<128xf32> to vector<1x128xf32>
    %19 = tpu.iota {dimensions = array<i32: 0>} : vector<16x128xi32>
    %c16_i32 = arith.constant 16 : i32
    %20 = arith.muli %arg0, %c16_i32 : i32
    %21 = vector.broadcast %20 : i32 to vector<16x128xi32>
    %22 = arith.addi %19, %21 : vector<16x128xi32>
    %23 = vector.broadcast %18 : vector<1x128xf32> to vector<16x128xf32>
    %24 = arith.cmpf oeq, %16, %23 : vector<16x128xf32>
    %c1073741824_i32 = arith.constant 1073741824 : i32
    %25 = vector.broadcast %c1073741824_i32 : i32 to vector<16x128xi32>
    %26 = arith.select %24, %22, %25 : vector<16x128xi1>, vector<16x128xi32>
    %cst_11 = arith.constant dense<2147483647> : vector<128xi32>
    %27 = vector.multi_reduction <minsi>, %26, %cst_11 [0] : vector<16x128xi32> to vector<128xi32>
    %28 = vector.shape_cast %27 : vector<128xi32> to vector<1x128xi32>
    %c0_12 = arith.constant 0 : index
    %c0_13 = arith.constant 0 : index
    %29 = vector.load %arg5[%c0_12, %c0_13] : memref<1x128xf32, #tpu.memory_space<vmem>>, vector<1x128xf32>
    %c0_14 = arith.constant 0 : index
    %c0_15 = arith.constant 0 : index
    %30 = vector.load %arg4[%c0_14, %c0_15] : memref<1x128xi32, #tpu.memory_space<vmem>>, vector<1x128xi32>
    %31 = arith.maximumf %29, %18 : vector<1x128xf32>
    %32 = arith.cmpf oeq, %29, %31 : vector<1x128xf32>
    %c1073741824_i32_16 = arith.constant 1073741824 : i32
    %33 = vector.broadcast %c1073741824_i32_16 : i32 to vector<1x128xi32>
    %34 = arith.select %32, %30, %33 : vector<1x128xi1>, vector<1x128xi32>
    %35 = arith.cmpf oeq, %18, %31 : vector<1x128xf32>
    %c1073741824_i32_17 = arith.constant 1073741824 : i32
    %36 = vector.broadcast %c1073741824_i32_17 : i32 to vector<1x128xi32>
    %37 = arith.select %35, %28, %36 : vector<1x128xi1>, vector<1x128xi32>
    %c0_18 = arith.constant 0 : index
    %c0_19 = arith.constant 0 : index
    %38 = vector.load %arg5[%c0_18, %c0_19] : memref<1x128xf32, #tpu.memory_space<vmem>>, vector<1x128xf32>
    tpu.vector_store %arg5[%c0_18, %c0_19], %31 {strides = array<i32>} : memref<1x128xf32, #tpu.memory_space<vmem>>, vector<1x128xf32>,
    %39 = arith.minsi %34, %37 : vector<1x128xi32>
    %c0_20 = arith.constant 0 : index
    %c0_21 = arith.constant 0 : index
    %40 = vector.load %arg4[%c0_20, %c0_21] : memref<1x128xi32, #tpu.memory_space<vmem>>, vector<1x128xi32>
    tpu.vector_store %arg4[%c0_20, %c0_21], %39 {strides = array<i32>} : memref<1x128xi32, #tpu.memory_space<vmem>>, vector<1x128xi32>,
    return
  }
  func.func @transform_0(%arg0: i32) -> (i32, i32) {
    %c0_i32 = arith.constant 0 : i32
    %c0_i32_0 = arith.constant 0 : i32
    return %arg0, %c0_i32 : i32, i32
  }
  func.func @transform_1(%arg0: i32) -> (i32, i32) {
    %c0_i32 = arith.constant 0 : i32
    %c0_i32_0 = arith.constant 0 : i32
    %c0_i32_1 = arith.constant 0 : i32
    return %c0_i32, %c0_i32_0 : i32, i32
  }
  func.func @transform_2(%arg0: i32) -> (i32, i32) {
    %c0_i32 = arith.constant 0 : i32
    %c0_i32_0 = arith.constant 0 : i32
    %c0_i32_1 = arith.constant 0 : i32
    return %c0_i32, %c0_i32_0 : i32, i32
  }
  func.func @transform_3(%arg0: i32) -> (i32, i32) {
    %c0_i32 = arith.constant 0 : i32
    %c0_i32_0 = arith.constant 0 : i32
    %c0_i32_1 = arith.constant 0 : i32
    return %c0_i32, %c0_i32_0 : i32, i32
  }
}

</mosaic_0001>

<bundles_post_ra>
// kernel: mnn_match_core.3
= control target key start
LH: loop header
LB: loop body
LE: loop exit
PB: predicated region body
PF: predicated region fallthrough
CT: control target
= control target key end

     0   :  { %v397_v1 = vmov 0.0   ;;  %vm398_vm0 = vmmov 0   ;;  %s534_s0 = inlined_call_operand.vmem [shape: s32[1,128], index: 0, kind: input, shape index: {}]   ;;  %s535_s1 = inlined_call_operand.vmem [shape: bf16[16,128], index: 1, kind: input, shape index: {}]   ;;  %s536_s2 = inlined_call_operand.vmem [shape: bf16[128,128], index: 2, kind: input, shape index: {}]   ;;  %s537_s3 = inlined_call_operand.vmem [shape: f32[1,128], index: 3, kind: input, shape index: {}]   ;;  %s538_s4 = inlined_call_operand.vmem [shape: f32[8,128], index: 4, kind: input, shape index: {}]   ;;  %s539_s5 = inlined_call_operand.vmem [shape: f32[16,2], index: 5, kind: input, shape index: {}]   ;;  %s540_s6 = inlined_call_operand.hbm [shape: f32[16,128], index: 6, kind: output, shape index: {}]  }
   0x1   :  { %v360_v0 = vld [vmem:[%s536_s2] sm:$0xff]   ;;  %331 = vmatprep.subr.bf16.mxu0 %v397_v1  ;;  %347 = vmatprep.mubr.msk.bf16.mxu0 %vm398_vm0, %v397_v1  ;;  %v361_v2 = vld [vmem:[%s536_s2 + $0x8] sm:$0xff]  }
   0x2   :  { %332 = vmatpush3.bf16.xpose.msra.mxu0 %v360_v0 }
   0x3   :  { %333 = vmatprep.subr.bf16.mxu0 %v397_v1 }
   0x4   :  { %11 = vsyncpa [#allocation3], 0  ;;  %v362_v3 = vld [vmem:[%s536_s2 + $0x10] sm:$0xff]   ;;  %v363_v4 = vld [vmem:[%s536_s2 + $0x18] sm:$0xff]   ;;  %v399_v10 = vmov 0   ;;  %v145_v11 = vlaneseq  ;;  %s400_s21 = smov 127  }
   0x5   :  { %v364_v5 = vld [vmem:[%s536_s2 + $0x20] sm:$0xff]   ;;  %v365_v6 = vld [vmem:[%s536_s2 + $0x28] sm:$0xff]   ;;  %v366_v7 = vld [vmem:[%s536_s2 + $0x30] sm:$0xff]   ;;  %358 = vset.pattern.permute.xlu0 %v399_v10  ;;  %359 = vset.pattern.permute.xlu1 %v399_v10 }
   0x6   :  { %v367_v8 = vld [vmem:[%s536_s2 + $0x38] sm:$0xff]   ;;  %v368_v9 = vld [vmem:[%s535_s1] sm:$0xff]   ;;  %v478_v13 = vshrl.u32 %v145_v11, 7  ;;  %v481_v25 = vand.u32 127, %v145_v11  ;;  %v237_v61 = vld [vmem:[%s539_s5 + $0x8] sm:$0xff] }
   0x7   :  { %v43_v12 = vld [vmem:[%s537_s3] sm:$0x1]  ;;  %v321_v48 = vld [vmem:[%s538_s4 + $0x1] ss:$0 sm:$0xff] }
   0x8   :  { %vm143_vm1 = vcmp.gt.f32.partialorder %v43_v12, 0.5  ;;  %v147_v14 = vsub.s32 0, %v478_v13  ;;  %v320_v54 = vld [vmem:[%s538_s4] ss:$0 sm:$0xff] }
   0x9   :  { %v144_v15 = vsel %vm143_vm1, 1, %v399_v10  ;;  %v236_v58 = vld [vmem:[%s539_s5] sm:$0xff] }
   0xa   :  { %334 = vmatpush3.bf16.xpose.msra.mxu0 %v361_v2  ;;  %v148_v16 = vrot.slane %v144_v15, %v147_v14 }
   0xb   :  { %335 = vmatprep.subr.bf16.mxu0 %v397_v1 }
   0xc   :  { %vm149_vm2 = vcmp.eq.s32.totalorder %v148_v16, 1 }
  0x12   :  { %336 = vmatpush3.bf16.xpose.msra.mxu0 %v362_v3  ;;  %v194_v3 = vadd.s32 8, %v478_v13 }
  0x13   :  { %337 = vmatprep.subr.bf16.mxu0 %v397_v1 }
  0x1a   :  { %338 = vmatpush3.bf16.xpose.msra.mxu0 %v363_v4  ;;  %v319_v4 = vld [vmem:[%s534_s0] ss:$0 sm:$0xff]  ;;  %s401_s0 = smov [#allocation2]  }
  0x1b   :  { %339 = vmatprep.subr.bf16.mxu0 %v397_v1  ;;  %vm205_vm11 = vcmp.eq.s32.totalorder %v319_v4, %v194_v3  ;;  %vm204_vm13 = vcmp.eq.s32.totalorder %v319_v4, %v478_v13  ;;  %s299_s5 = sshll.u32 %s401_s0, 4  ;;  %s300_s5 = int_to_ptr.vmem [resolvable:$true] %s299_s5 }
  0x1c   :  { %s373_s24 = scalar_lea.vmem %s300_s5, 256  ;;  %p378_p1 = scmp.lt.s32.totalorder %s300_s5, %s300_s5 }
  0x1d   :  { %p374_p0 = scmp.ne.s32.totalorder %s300_s5, %s373_s24  ;;  %p379_p2 = scmp.lt.s32.totalorder %s373_s24, %s373_s24 }
  0x1f   :  { %p380_p3 = por %p379_p2, %p378_p1 }
  0x21   :  { %p381_p4 = pnand %p380_p3, %p374_p0 }
  0x22   :  { %340 = vmatpush3.bf16.xpose.msra.mxu0 %v364_v5 }
  0x23   :  { %341 = vmatprep.subr.bf16.mxu0 %v397_v1 }
  0x2a   :  { %342 = vmatpush3.bf16.xpose.msra.mxu0 %v365_v6 }
  0x2b   :  { %343 = vmatprep.subr.bf16.mxu0 %v397_v1 }
  0x32   :  { %344 = vmatpush3.bf16.xpose.msra.mxu0 %v366_v7 }
  0x33   :  { %345 = vmatprep.subr.bf16.mxu0 %v397_v1 }
  0x3a   :  { %346 = vmatpush3.bf16.xpose.msra.mxu0 %v367_v8 }
  0x41   :  { %348 = vmatmul.mubr.bf16.vlgmr.msra.gmra.mrb[0].mxu0 %v368_v9 }
 0x114   :  { %v132_v17 = vpop.f32.mrb[0].mxu0 }
 0x115   :  { %vm139_vm3 = vcmp.lt.f32.partialorder %v132_v17, 0.9  ;;  %v349_v18 = vpop.f32.mrb[1].mxu0 }
 0x116   :  { %v135_v19 = vpop.f32.mrb[2].mxu0  ;;  %v141_v20 = vsel %vm139_vm3, 0.0, %v132_v17  ;;  %vm273_vm3 = vcmp.eq.s32.totalorder %v481_v25, 3 }
 0x117   :  { %vm140_vm4 = vcmp.lt.f32.partialorder %v135_v19, 0.9  ;;  %v350_v21 = vpop.f32.mrb[3].mxu0  ;;  %v150_v22 = vsel %vm149_vm2, %v141_v20, -1.0 }
 0x118   :  { %152 = vmax.xlane.f32.xlu0 %v150_v22  ;;  %v142_v23 = vsel %vm140_vm4, 0.0, %v135_v19  ;;  %vm272_vm4 = vcmp.eq.s32.totalorder %v481_v25, 2 }
 0x119   :  { %v151_v24 = vsel %vm149_vm2, %v142_v23, -1.0 }
 0x11c   :  { %154 = vmax.xlane.f32.xlu0 %v151_v24 }
 0x1a5   :  { %v153_v26 = vpop.xlane.xlu0 %152 }
 0x1a6   :  { %vm158_vm5 = vcmp.eq.f32.partialorder %v150_v22, %v153_v26 }
 0x1a7   :  { %v160_v27 = vsel %vm158_vm5, %v481_v25, 1073741824  ;;  %vm271_vm5 = vcmp.eq.s32.totalorder %v481_v25, 1 }
 0x1a8   :  { %v163_v28 = vshra.s32 %v160_v27, 16  ;;  %v162_v34 = vand.u32 65535, %v160_v27 }
 0x1a9   :  { %v155_v29 = vpop.xlane.xlu0 %154 }
 0x1aa   :  { %vm159_vm6 = vcmp.eq.f32.partialorder %v151_v24, %v155_v29  ;;  %v165_v30 = vcvt.s32.f32 %v163_v28  ;;  %v164_v37 = vcvt.s32.f32 %v162_v34 }
 0x1ab   :  { %v161_v31 = vsel %vm159_vm6, %v481_v25, 1073741824  ;;  %vm270_vm6 = vcmp.eq.s32.totalorder %v481_v25, 0 }
 0x1ac   :  { %166 = vmin.xlane.f32.xlu1 %v165_v30  ;;  %v177_v32 = vshra.s32 %v161_v31, 16  ;;  %v176_v35 = vand.u32 65535, %v161_v31 }
 0x1ae   :  { %v179_v33 = vcvt.s32.f32 %v177_v32  ;;  %v178_v40 = vcvt.s32.f32 %v176_v35 }
 0x1b0   :  { %180 = vmin.xlane.f32.xlu1 %v179_v33 }
 0x239   :  { %v167_v36 = vpop.xlane.xlu1 %166 }
 0x23a   :  { %vm168_vm7 = vcmp.eq.f32.partialorder %v165_v30, %v167_v36  ;;  %v173_v42 = vcvt.f32.s32 %v167_v36 }
 0x23b   :  { %v169_v38 = vsel %vm168_vm7, %v164_v37, inf }
 0x23c   :  { %170 = vmin.xlane.f32.xlu0 %v169_v38  ;;  %v174_v44 = vshll.u32 %v173_v42, 16 }
 0x23d   :  { %v181_v39 = vpop.xlane.xlu1 %180 }
 0x23e   :  { %vm182_vm8 = vcmp.eq.f32.partialorder %v179_v33, %v181_v39  ;;  %v187_v45 = vcvt.f32.s32 %v181_v39 }
 0x23f   :  { %v183_v41 = vsel %vm182_vm8, %v178_v40, inf }
 0x240   :  { %184 = vmin.xlane.f32.xlu1 %v183_v41  ;;  %v188_v50 = vshll.u32 %v187_v45, 16 }
 0x2c9   :  { %v171_v43 = vpop.xlane.xlu0 %170 }
 0x2ca   :  { %v172_v46 = vcvt.f32.s32 %v171_v43 }
 0x2cc   :  { %v175_v47 = vadd.s32 %v174_v44, %v172_v46 }
 0x2cd   :  { %v185_v49 = vpop.xlane.xlu1 %184 }
 0x2ce   :  { %v186_v51 = vcvt.f32.s32 %v185_v49  ;;  %vm190_vm9 = vcmp.eq.s32.totalorder %v481_v25, %v175_v47 }
 0x2cf   :  { %v230_v52 = vsel %vm190_vm9, %v321_v48, 0.0  ;;  %v220_v56 = vsel %vm190_vm9, %v320_v54, 0.0  ;;  %vm206_vm14 = vmand %vm190_vm9, %vm204_vm13 }
 0x2d0   :  { %v189_v53 = vadd.s32 %v188_v50, %v186_v51  ;;  %232 = vadd.xlane.f32.xlu0 %v230_v52  ;;  %v208_v6 = vsel %vm206_vm14, 1.0, %v397_v1 }
 0x2d2   :  { %vm191_vm10 = vcmp.eq.s32.totalorder %v481_v25, %v189_v53 }
 0x2d3   :  { %v231_v55 = vsel %vm191_vm10, %v321_v48, 0.0  ;;  %v221_v57 = vsel %vm191_vm10, %v320_v54, 0.0  ;;  %vm207_vm12 = vmand %vm191_vm10, %vm205_vm11 }
 0x2d4   :  { %234 = vadd.xlane.f32.xlu1 %v231_v55  ;;  %222 = vadd.xlane.f32.xlu0 %v220_v56  ;;  %v209_v5 = vsel %vm207_vm12, 1.0, %v397_v1 }
 0x2d8   :  { %224 = vadd.xlane.f32.xlu1 %v221_v57 }
 0x35d   :  { %v233_v59 = vpop.xlane.xlu0 %232 }
 0x35e   :  { %v240_v60 = vsub.f32 %v236_v58, %v233_v59 }
 0x360   :  { %v244_v62 = vmul.f32 %v240_v60, %v240_v60 }
 0x361   :  { %v235_v63 = vpop.xlane.xlu1 %234  ;;  %v223_v7 = vpop.xlane.xlu0 %222 }
 0x362   :  { %v241_v0 = vsub.f32 %v237_v61, %v235_v63  ;;  %248 = vrot.lane.b32.xlu0 %v244_v62, %s400_s21  ;;  %v238_v8 = vsub.f32 %v236_v58, %v223_v7 }
 0x364   :  { %v245_v2 = vmul.f32 %v241_v0, %v241_v0  ;;  %v242_v10 = vmul.f32 %v238_v8, %v238_v8 }
 0x365   :  { %v225_v9 = vpop.xlane.xlu1 %224 }
 0x366   :  { %250 = vrot.lane.b32.xlu1 %v245_v2, %s400_s21  ;;  %v239_v11 = vsub.f32 %v237_v61, %v225_v9 }
 0x368   :  { %v243_v15 = vmul.f32 %v239_v11, %v239_v11 }
 0x381   :  { %212 = vmax.xlane.f32.xlu0 %v209_v5 }
 0x38a   :  { %210 = vmax.xlane.f32.xlu1 %v208_v6 }
 0x3d4   :  { %v249_v12 = vpop.permute.xlu0 %248 }
 0x3d5   :  { %v254_v14 = vadd.f32 %v249_v12, %v242_v10 }
 0x3d7   :  { %369 = vrsqrt.f32 %v254_v14  ;;  %vm258_vm15 = vcmp.eq.f32.partialorder %v254_v14, inf  ;;  %v261_v19 = vand.u32 2147483648, %v254_v14  ;;  %vm260_vm0 = vcmp.eq.f32.partialorder %v254_v14, 0.0 }
 0x3d8   :  { %v251_v16 = vpop.permute.xlu1 %250 }
 0x3d9   :  { %v255_v17 = vadd.f32 %v251_v16, %v243_v15 }
 0x3db   :  { %371 = vrsqrt.f32 %v255_v17  ;;  %vm265_vm1 = vcmp.eq.f32.partialorder %v255_v17, inf  ;;  %v268_v23 = vand.u32 2147483648, %v255_v17  ;;  %vm267_vm2 = vcmp.eq.f32.partialorder %v255_v17, 0.0 }
 0x3e1   :  { %v370_v18 = vpop.eup %369 }
 0x3e2   :  { %v257_v13 = vmul.f32 %v370_v18, %v254_v14 }
 0x3e4   :  { %v259_v20 = vsel %vm258_vm15, %v254_v14, %v257_v13 }
 0x3e5   :  { %v372_v1 = vpop.eup %371  ;;  %v262_v21 = vsel %vm260_vm0, %v261_v19, %v259_v20 }
 0x3e6   :  { %276 = vperm.xlu0 %358, %v262_v21   ;;  %v264_v22 = vmul.f32 %v372_v1, %v255_v17 }
 0x3e8   :  { %v266_v24 = vsel %vm265_vm1, %v255_v17, %v264_v22 }
 0x3e9   :  { %v269_v26 = vsel %vm267_vm2, %v268_v23, %v266_v24 }
 0x3ea   :  { %281 = vperm.xlu1 %359, %v269_v26  }
 0x40e   :  { %v213_v27 = vpop.xlane.xlu0 %212 }
 0x417   :  { %v211_v28 = vpop.xlane.xlu1 %210 }
 0x465   :  { %v277_v29 = vpop.permute.xlu0 %276 }
 0x466   :  { %v284_v30 = vsel %vm273_vm3, %v277_v29, 0.0 }
 0x467   :  { %v286_v31 = vsel %vm272_vm4, %v233_v59, %v284_v30 }
 0x468   :  { %v288_v32 = vsel %vm271_vm5, %v223_v7, %v286_v31 }
 0x469   :  { %v290_v33 = vsel %vm270_vm6, %v211_v28, %v288_v32  ;;  %v282_v34 = vpop.permute.xlu1 %281 }
 0x46a   :  { %292 = vst [vmem:[#allocation2] sm:$0xff] %v290_v33  ;;  %v285_v35 = vsel %vm273_vm3, %v282_v34, 0.0 }
 0x46b   :  { %v287_v36 = vsel %vm272_vm4, %v235_v63, %v285_v35 }
 0x46c   :  { %v289_v37 = vsel %vm271_vm5, %v225_v9, %v287_v36 }
 0x46d   :  { %v291_v38 = vsel %vm270_vm6, %v213_v27, %v289_v37 }
 0x46e   :  { %293 = vst [vmem:[#allocation2 + $0x8] sm:$0xff] %v291_v38 }
 0x46f   :  { %384 = shalt.err (!%p381_p4)
}
 0x470   :  { %s385_s27 = scalar_lea.hbm %s540_s6, 256 }
 0x471   :  { %p386_p5 = scmp.ne.s32.totalorder %s540_s6, %s385_s27  ;;  %p389_p6 = scmp.lt.u32.totalorder %s385_s27, %s540_s6 }
 0x473   :  { %p391_p7 = pnand %p389_p6, %p386_p5 }
 0x475   :  { %394 = shalt.err (!%p391_p7)
}
 0x476   :  { %s402_s8 = smov 128   ;;  %s403_s9 = smov 8  }
 0x477   :  { %305 = dma.vmem_to_hbm [thread:$0]  %s300_s5, 256, %s540_s6, [#allocation3], %s402_s8, %s402_s8, %s403_s9  }
 0x478   :  { %395 = dma.done.wait [#allocation3], 256  }
 0x479   :  { %396 = vsyncadd [#allocation3], 4294967040 }
 0x47a   :  { %309 = vsyncpa [#allocation3], 1 }

// kernel: mnn_match_core.2
= control target key start
LH: loop header
LB: loop body
LE: loop exit
PB: predicated region body
PF: predicated region fallthrough
CT: control target
= control target key end

     0   :  { %v244_v0 = vmov 0.0   ;;  %vm245_vm0 = vmmov 0   ;;  %v246_v10 = vmov -2.0   ;;  %v247_v11 = vmov 1073741824   ;;  %s308_s1 = inlined_call_operand.vmem [shape: bf16[128,128], index: 1, kind: input, shape index: {}]   ;;  %s309_s0 = inlined_call_operand.vmem [shape: bf16[16,128], index: 0, kind: input, shape index: {}]   ;;  %s310_s3 = inlined_call_operand.vmem [shape: s32[1,128], index: 3, kind: output, shape index: {}]   ;;  %s311_s2 = inlined_call_operand.vmem [shape: f32[1,128], index: 2, kind: input, shape index: {}]  }
   0x1   :  { %210 = vmatprep.subr.bf16.mxu0 %v244_v0  ;;  %v235_v1 = vld [vmem:[%s308_s1] sm:$0xff]   ;;  %226 = vmatprep.mubr.msk.bf16.mxu0 %vm245_vm0, %v244_v0  ;;  %v236_v2 = vld [vmem:[%s308_s1 + $0x8] sm:$0xff]   ;;  %v237_v3 = vld [vmem:[%s308_s1 + $0x10] sm:$0xff]   ;;  %19 = vst [vmem:[#allocation2] sm:$0x1] %v246_v10  ;;  %v141_v12 = vlaneseq  ;;  %v248_v16 = vmov 0  }
   0x2   :  { %211 = vmatpush3.bf16.xpose.msra.mxu0 %v235_v1  ;;  %v238_v4 = vld [vmem:[%s308_s1 + $0x18] sm:$0xff]   ;;  %v239_v5 = vld [vmem:[%s308_s1 + $0x20] sm:$0xff]   ;;  %v240_v6 = vld [vmem:[%s308_s1 + $0x28] sm:$0xff]   ;;  %20 = vst [vmem:[%s310_s3] sm:$0x1] %v247_v11 }
   0x3   :  { %212 = vmatprep.subr.bf16.mxu0 %v244_v0  ;;  %v241_v7 = vld [vmem:[%s308_s1 + $0x30] sm:$0xff]   ;;  %v242_v8 = vld [vmem:[%s308_s1 + $0x38] sm:$0xff]   ;;  %v243_v9 = vld [vmem:[%s309_s0] sm:$0xff]   ;;  %v142_v14 = vshrl.u32 %v141_v12, 7 }
   0x4   :  { %v39_v13 = vld [vmem:[%s311_s2] sm:$0x1] }
   0x5   :  { %vm139_vm1 = vcmp.gt.f32.partialorder %v39_v13, 0.5  ;;  %v143_v15 = vsub.s32 0, %v142_v14  ;;  %v157_v33 = vadd.s32 8, %v142_v14 }
   0x6   :  { %v140_v17 = vsel %vm139_vm1, 1, %v248_v16 }
   0x7   :  { %v144_v18 = vrot.slane %v140_v17, %v143_v15 }
   0x8   :  { %v177_v34 = vld [vmem:[#allocation2] sm:$0x1] }
   0x9   :  { %vm145_vm3 = vcmp.eq.s32.totalorder %v144_v18, 1  ;;  %v178_v45 = vld [vmem:[%s310_s3] sm:$0x1] }
   0xa   :  { %213 = vmatpush3.bf16.xpose.msra.mxu0 %v236_v2 }
   0xb   :  { %214 = vmatprep.subr.bf16.mxu0 %v244_v0 }
  0x12   :  { %215 = vmatpush3.bf16.xpose.msra.mxu0 %v237_v3 }
  0x13   :  { %216 = vmatprep.subr.bf16.mxu0 %v244_v0 }
  0x1a   :  { %217 = vmatpush3.bf16.xpose.msra.mxu0 %v238_v4 }
  0x1b   :  { %218 = vmatprep.subr.bf16.mxu0 %v244_v0 }
  0x22   :  { %219 = vmatpush3.bf16.xpose.msra.mxu0 %v239_v5 }
  0x23   :  { %220 = vmatprep.subr.bf16.mxu0 %v244_v0 }
  0x2a   :  { %221 = vmatpush3.bf16.xpose.msra.mxu0 %v240_v6 }
  0x2b   :  { %222 = vmatprep.subr.bf16.mxu0 %v244_v0 }
  0x32   :  { %223 = vmatpush3.bf16.xpose.msra.mxu0 %v241_v7 }
  0x33   :  { %224 = vmatprep.subr.bf16.mxu0 %v244_v0 }
  0x3a   :  { %225 = vmatpush3.bf16.xpose.msra.mxu0 %v242_v8 }
  0x41   :  { %227 = vmatmul.mubr.bf16.vlgmr.msra.gmra.mrb[0].mxu0 %v243_v9 }
 0x114   :  { %v128_v19 = vpop.f32.mrb[0].mxu0 }
 0x115   :  { %vm135_vm2 = vcmp.lt.f32.partialorder %v128_v19, 0.9  ;;  %v228_v20 = vpop.f32.mrb[1].mxu0 }
 0x116   :  { %v137_v21 = vsel %vm135_vm2, 0.0, %v128_v19  ;;  %v131_v22 = vpop.f32.mrb[2].mxu0 }
 0x117   :  { %vm136_vm4 = vcmp.lt.f32.partialorder %v131_v22, 0.9  ;;  %v229_v23 = vpop.f32.mrb[3].mxu0  ;;  %v146_v25 = vsel %vm145_vm3, %v137_v21, -1.0 }
 0x118   :  { %v138_v24 = vsel %vm136_vm4, 0.0, %v131_v22 }
 0x119   :  { %v147_v26 = vsel %vm145_vm3, %v138_v24, -1.0 }
 0x11a   :  { %v148_v27 = vmax.f32 %v146_v25, %v147_v26 }
 0x11c   :  { %v149_v28 = vrot.slane %v148_v27, 4 }
 0x11e   :  { %v150_v29 = vmax.f32 %v148_v27, %v149_v28 }
 0x120   :  { %v151_v30 = vrot.slane %v150_v29, 2 }
 0x122   :  { %v152_v31 = vmax.f32 %v150_v29, %v151_v30 }
 0x124   :  { %v153_v32 = vrot.slane %v152_v31, 1 }
 0x126   :  { %v154_v35 = vmax.f32 %v152_v31, %v153_v32 }
 0x128   :  { %vm162_vm5 = vcmp.eq.f32.partialorder %v146_v25, %v154_v35  ;;  %vm163_vm6 = vcmp.eq.f32.partialorder %v147_v26, %v154_v35  ;;  %v179_v36 = vmax.f32 %v177_v34, %v154_v35 }
 0x129   :  { %v164_v37 = vsel %vm162_vm5, %v142_v14, 1073741824  ;;  %v165_v38 = vsel %vm163_vm6, %v157_v33, 1073741824 }
 0x12a   :  { %vm166_vm7 = vcmp.lt.s32.totalorder %v164_v37, %v165_v38  ;;  %184 = vst [vmem:[#allocation2] sm:$0x1] %v179_v36  ;;  %vm180_vm10 = vcmp.eq.f32.partialorder %v177_v34, %v179_v36  ;;  %vm182_vm12 = vcmp.eq.f32.partialorder %v154_v35, %v179_v36 }
 0x12b   :  { %v167_v39 = vsel %vm166_vm7, %v164_v37, %v165_v38  ;;  %v181_v47 = vsel %vm180_vm10, %v178_v45, 1073741824 }
 0x12c   :  { %v168_v40 = vrot.slane %v167_v39, 4 }
 0x12e   :  { %vm169_vm8 = vcmp.lt.s32.totalorder %v167_v39, %v168_v40 }
 0x12f   :  { %v170_v41 = vsel %vm169_vm8, %v167_v39, %v168_v40 }
 0x130   :  { %v171_v42 = vrot.slane %v170_v41, 2 }
 0x132   :  { %vm172_vm9 = vcmp.lt.s32.totalorder %v170_v41, %v171_v42 }
 0x133   :  { %v173_v43 = vsel %vm172_vm9, %v170_v41, %v171_v42 }
 0x134   :  { %v174_v44 = vrot.slane %v173_v43, 1 }
 0x136   :  { %vm175_vm11 = vcmp.lt.s32.totalorder %v173_v43, %v174_v44 }
 0x137   :  { %v176_v46 = vsel %vm175_vm11, %v173_v43, %v174_v44 }
 0x138   :  { %v183_v48 = vsel %vm182_vm12, %v176_v46, 1073741824 }
 0x139   :  { %vm185_vm13 = vcmp.lt.s32.totalorder %v181_v47, %v183_v48 }
 0x13a   :  { %v186_v49 = vsel %vm185_vm13, %v181_v47, %v183_v48 }
 0x13b   :  { %187 = vst [vmem:[%s310_s3] sm:$0x1] %v186_v49 }

</bundles_post_ra>
